<compile_context>
chip_gen: v5e
topology: v5e:2x2
jax: 0.10.0
libtpu: 0.0.40
codegen_flags: <defaults>
</compile_context>

<pallas_src>
import functools

import jax
import jax.numpy as jnp
from jax.experimental import pallas as pl
from jax.experimental.pallas import tpu as pltpu

LEAKY_SLOPE = 0.3
LN_EPS = 1e-5
LANE = 128
MIB = 1024 * 1024


def _round_up(x, m):
    return ((x + m - 1) // m) * m


def _leaky_relu(x):
    return jnp.where(x > 0, x, LEAKY_SLOPE * x)


def _layernorm_padded(x, gamma, beta, n_valid):
    """LayerNorm over the last dim of a zero-padded tile.

    Padded columns of `x` are exactly 0 (zero-padded weights/biases upstream,
    LeakyReLU(0)=0, previous LN had gamma=beta=0 in the pads), so unmasked
    sums over the full padded width equal the sums over the valid columns and
    the E[x^2] - mean^2 variance is exact.  Padded output columns carry
    gamma=beta=0 and therefore stay 0.
    """
    inv_n = 1.0 / float(n_valid)
    s1 = jnp.sum(x, axis=-1, keepdims=True)
    s2 = jnp.sum(x * x, axis=-1, keepdims=True)
    mean = s1 * inv_n
    var = jnp.maximum(s2 * inv_n - mean * mean, 0.0)
    inv = jax.lax.rsqrt(var + LN_EPS)
    return (x - mean) * inv * gamma + beta


def _efr_kernel(x_ref,
                w1_ref, b1_ref, w2_ref, b2_ref,
                w3_ref, b3_ref, g1_ref, be1_ref,
                w4_ref, b4_ref, g2_ref, be2_ref,
                out_ref,
                *, hid, out_dim, mdtype):
    xm = x_ref[...]                        # (tile_rows, in_pad), matmul dtype
    x = xm.astype(jnp.float32)             # no-op convert when mdtype == f32

    # Small vectors, read once (f32).
    b1 = b1_ref[...]
    b2 = b2_ref[...]
    b3 = b3_ref[...]
    g1 = g1_ref[...]
    be1 = be1_ref[...]
    b4 = b4_ref[...]
    g2 = g2_ref[...]
    be2 = be2_ref[...]

    # ---- attention branch ----
    h1 = jnp.dot(xm, w1_ref[...], preferred_element_type=jnp.float32) + b1
    h1 = _leaky_relu(h1)
    h2 = jnp.dot(h1.astype(mdtype), w2_ref[...],
                 preferred_element_type=jnp.float32) + b2
    # sigmoid(x) == 0.5 * tanh(0.5 * x) + 0.5 : single EUP transcendental.
    attn = 0.5 * jnp.tanh(0.5 * h2) + 0.5

    # ---- weighted features ----
    w = x * attn

    # ---- projection branch ----
    p1 = jnp.dot(w.astype(mdtype), w3_ref[...],
                 preferred_element_type=jnp.float32) + b3
    p1 = _leaky_relu(p1)
    p1 = _layernorm_padded(p1, g1, be1, hid)
    # Dropout(0.1): identity in eval mode.
    # TODO(synk): training-mode dropout would use pltpu.prng_seed / prng_random_bits.
    p2 = jnp.dot(p1.astype(mdtype), w4_ref[...],
                 preferred_element_type=jnp.float32) + b4
    p2 = _layernorm_padded(p2, g2, be2, out_dim)

    out_ref[...] = p2.astype(out_ref.dtype)


def _pad2(a, r, c):
    return jnp.pad(a, ((0, r - a.shape[0]), (0, c - a.shape[1])))


def _vmem_capacity_bytes():
    try:
        return int(pltpu.get_tpu_info().vmem_capacity_bytes)
    except Exception:
        return 64 * MIB          # conservative: v7x per-TensorCore capacity


def enhanced_feature_reduction(x, params, *, tile_rows=None,
                               matmul_dtype=jnp.bfloat16):
    """x: (batch, seq, in_dim) float32 -> (batch, seq, out_dim) float32."""
    b, s, in_dim = x.shape
    out_dim = params["w4"].shape[1]
    hid = in_dim // 2
    rows = b * s

    # Lane-dense padded feature dims (multiples of 128).
    in_pad = _round_up(in_dim, LANE)
    hid_pad = _round_up(hid, LANE)
    out_pad = _round_up(out_dim, LANE)

    w_item = jnp.dtype(matmul_dtype).itemsize

    # Resident weights are single-copy (not double-buffered).
    weight_bytes = ((2 * in_pad * in_pad + in_pad * hid_pad + hid_pad * out_pad)
                    * w_item
                    + (2 * in_pad + 3 * hid_pad + 3 * out_pad) * 4)

    # Per-row VMEM cost: pipelined x tile (matmul dtype, up to 3-deep),
    # double-buffered f32 out tile, plus f32 intermediates and bf16 casts.
    per_row = (3 * in_pad * w_item
               + 2 * out_pad * 4
               + 4 * (5 * in_pad + 3 * hid_pad + 2 * out_pad))

    vmem_cap = _vmem_capacity_bytes()
    budget_cap = int(vmem_cap * 0.8)     # headroom for compiler scratch

    if weight_bytes + 8 * per_row > budget_cap:
        # TODO(synk): for very large in_dim, stop holding W1/W2 whole-array
        # resident and stream them over a K grid axis ("arbitrary") with an
        # f32 accumulator in scratch_shapes.
        raise NotImplementedError(
            "EnhancedFeatureReduction weights do not fit in VMEM; "
            "K-streamed weight variant not implemented.")

    # Row tile: as many rows as the leftover VMEM allows.  No forced grid
    # splitting: duplicating the resident weights across v7x TensorCores for
    # tiny inputs (or extra serial steps on v5e/v6e) is net-negative; a
    # naturally multi-step grid still gets sharded via "parallel" semantics.
    if tile_rows is None:
        avail = budget_cap - weight_bytes - 4 * MIB
        tile_rows = avail // per_row
    tile_rows = int(min(tile_rows, _round_up(rows, 8), 2048))
    tile_rows = max(8, (tile_rows // 8) * 8)
    rows_pad = _round_up(rows, tile_rows)
    grid = rows_pad // tile_rows

    # ---- wrapper-side layout plumbing (zero padding; sliced off after) ----
    x2 = x.reshape(rows, in_dim)
    x2 = jnp.pad(x2, ((0, rows_pad - rows), (0, in_pad - in_dim)))
    x2 = x2.astype(matmul_dtype)          # halves the per-step x DMA for bf16

    w1 = _pad2(params["w1"], in_pad, in_pad).astype(matmul_dtype)
    w2 = _pad2(params["w2"], in_pad, in_pad).astype(matmul_dtype)
    w3 = _pad2(params["w3"], in_pad, hid_pad).astype(matmul_dtype)
    w4 = _pad2(params["w4"], hid_pad, out_pad).astype(matmul_dtype)
    b1 = _pad2(params["b1"], 1, in_pad)
    b2 = _pad2(params["b2"], 1, in_pad)
    b3 = _pad2(params["b3"], 1, hid_pad)
    g1 = _pad2(params["g1"], 1, hid_pad)      # pads 0 -> padded LN cols stay 0
    be1 = _pad2(params["beta1"], 1, hid_pad)
    b4 = _pad2(params["b4"], 1, out_pad)
    g2 = _pad2(params["g2"], 1, out_pad)
    be2 = _pad2(params["beta2"], 1, out_pad)

    # ---- specs: x/out row-tiled & pipelined, params whole-array VMEM ----
    resident = pl.BlockSpec(memory_space=pltpu.MemorySpace.VMEM)

    use_deep = (grid > 1) and (in_pad <= 512)     # short per-step compute
    x_spec = pl.BlockSpec((tile_rows, in_pad), lambda i: (i, 0))
    if use_deep:
        try:
            x_spec = pl.BlockSpec((tile_rows, in_pad), lambda i: (i, 0),
                                  pipeline_mode=pl.Buffered(3))
        except TypeError:
            use_deep = False
    in_specs = [x_spec] + [resident] * 12
    out_specs = pl.BlockSpec((tile_rows, out_pad), lambda i: (i, 0))

    # ---- VMEM budget (weights single-copy + pipelined tiles + temporaries) ----
    io_bytes = ((3 if use_deep else 2) * tile_rows * in_pad * w_item
                + 2 * tile_rows * out_pad * 4)
    tmp_bytes = tile_rows * 4 * (5 * in_pad + 3 * hid_pad + 2 * out_pad)
    vmem_limit = int(min(budget_cap,
                         max(32 * MIB,
                             weight_bytes + io_bytes + tmp_bytes + 4 * MIB)))

    flops = 2 * rows_pad * (2 * in_pad * in_pad + in_pad * hid_pad
                            + hid_pad * out_pad)
    cost = pl.CostEstimate(
        flops=int(flops),
        transcendentals=int(rows_pad * in_pad),     # one tanh per attn element
        bytes_accessed=int(rows_pad * (in_pad * w_item + out_pad * 4)
                           + weight_bytes),
    )

    kernel = functools.partial(_efr_kernel, hid=hid, out_dim=out_dim,
                               mdtype=matmul_dtype)

    out = pl.pallas_call(
        kernel,
        out_shape=jax.ShapeDtypeStruct((rows_pad, out_pad), jnp.float32),
        grid_spec=pltpu.PrefetchScalarGridSpec(
            num_scalar_prefetch=0,
            grid=(grid,),
            in_specs=in_specs,
            out_specs=out_specs,
        ),
        compiler_params=pltpu.CompilerParams(
            dimension_semantics=("parallel",),
            vmem_limit_bytes=vmem_limit,
        ),
        cost_estimate=cost,
    )(
        x2,
        w1, b1, w2, b2,
        w3, b3, g1, be1,
        w4, b4, g2, be2,
    )
    return out[:rows, :out_dim].reshape(b, s, out_dim)


def init_params(key, in_dim, out_dim):
    hid = in_dim // 2
    ks = jax.random.split(key, 8)
    scale = 0.1
    return {
        "w1": scale * jax.random.normal(ks[0], (in_dim, in_dim), jnp.float32),
        "b1": scale * jax.random.normal(ks[1], (1, in_dim), jnp.float32),
        "w2": scale * jax.random.normal(ks[2], (in_dim, in_dim), jnp.float32),
        "b2": scale * jax.random.normal(ks[3], (1, in_dim), jnp.float32),
        "w3": scale * jax.random.normal(ks[4], (in_dim, hid), jnp.float32),
        "b3": scale * jax.random.normal(ks[5], (1, hid), jnp.float32),
        "g1": jnp.ones((1, hid), jnp.float32),
        "beta1": jnp.zeros((1, hid), jnp.float32),
        "w4": scale * jax.random.normal(ks[6], (hid, out_dim), jnp.float32),
        "b4": scale * jax.random.normal(ks[7], (1, out_dim), jnp.float32),
        "g2": jnp.ones((1, out_dim), jnp.float32),
        "beta2": jnp.zeros((1, out_dim), jnp.float32),
    }


def _layernorm_ref(x, gamma, beta):
    mean = jnp.mean(x, axis=-1, keepdims=True)
    var = jnp.mean(jnp.square(x - mean), axis=-1, keepdims=True)
    inv = jax.lax.rsqrt(var + LN_EPS)
    return (x - mean) * inv * gamma + beta


def _reference(x, p):
    """Pure-JAX f32 reference for correctness check."""
    h1 = _leaky_relu(x @ p["w1"] + p["b1"][0])
    attn = jax.nn.sigmoid(h1 @ p["w2"] + p["b2"][0])
    w = x * attn
    p1 = _leaky_relu(w @ p["w3"] + p["b3"][0])
    p1 = _layernorm_ref(p1, p["g1"][0], p["beta1"][0])
    p2 = p1 @ p["w4"] + p["b4"][0]
    return _layernorm_ref(p2, p["g2"][0], p["beta2"][0])


if __name__ == "__main__":
    key = jax.random.PRNGKey(0)
    k_x, k_p = jax.random.split(key)

    batch, seq, in_dim, out_dim = 2, 8, 32, 16
    x = jax.random.normal(k_x, (batch, seq, in_dim), jnp.float32)
    params = init_params(k_p, in_dim, out_dim)

    y_ref = _reference(x, params)

    # Full-f32 path (f32 x stream + f32 matmuls): tight check vs reference.
    y_f32 = jax.block_until_ready(
        enhanced_feature_reduction(x, params, matmul_dtype=jnp.float32))
    assert y_f32.shape == (batch, seq, out_dim)
    assert jnp.allclose(y_f32, y_ref, atol=1e-3, rtol=1e-3), "f32 mismatch vs reference"

    # Default path (bf16 x stream + bf16 MXU operands, f32 accumulation).
    y_bf16 = jax.block_until_ready(enhanced_feature_reduction(x, params))
    assert y_bf16.shape == (batch, seq, out_dim)
    assert jnp.allclose(y_bf16, y_ref, atol=5e-2, rtol=5e-2), "bf16 mismatch vs reference"

    print("KERNEL_OK")
</pallas_src>

<mosaic_0001>
module attributes {stable_mosaic.version = 11 : i64} {
  func.func @_efr_kernel(%arg0: i32, %arg1: memref<16x128xf32, #tpu.memory_space<vmem>>, %arg2: memref<128x128xf32, #tpu.memory_space<vmem>>, %arg3: memref<1x128xf32, #tpu.memory_space<vmem>>, %arg4: memref<128x128xf32, #tpu.memory_space<vmem>>, %arg5: memref<1x128xf32, #tpu.memory_space<vmem>>, %arg6: memref<128x128xf32, #tpu.memory_space<vmem>>, %arg7: memref<1x128xf32, #tpu.memory_space<vmem>>, %arg8: memref<1x128xf32, #tpu.memory_space<vmem>>, %arg9: memref<1x128xf32, #tpu.memory_space<vmem>>, %arg10: memref<128x128xf32, #tpu.memory_space<vmem>>, %arg11: memref<1x128xf32, #tpu.memory_space<vmem>>, %arg12: memref<1x128xf32, #tpu.memory_space<vmem>>, %arg13: memref<1x128xf32, #tpu.memory_space<vmem>>, %arg14: memref<16x128xf32, #tpu.memory_space<vmem>>) attributes {dimension_semantics = [#tpu.dimension_semantics<parallel>], iteration_bounds = array<i64: 1>, scalar_prefetch = 0 : i64, scratch_operands = 0 : i64, tpu.core_type = #tpu.core_type<tc>, window_params = [{transform_indices = @transform_0, window_bounds = array<i64: 16, 128>}, {pipeline_mode = #tpu.pipeline_mode<synchronous>, transform_indices = @transform_1, window_bounds = array<i64: 128, 128>}, {pipeline_mode = #tpu.pipeline_mode<synchronous>, transform_indices = @transform_2, window_bounds = array<i64: 1, 128>}, {pipeline_mode = #tpu.pipeline_mode<synchronous>, transform_indices = @transform_3, window_bounds = array<i64: 128, 128>}, {pipeline_mode = #tpu.pipeline_mode<synchronous>, transform_indices = @transform_4, window_bounds = array<i64: 1, 128>}, {pipeline_mode = #tpu.pipeline_mode<synchronous>, transform_indices = @transform_5, window_bounds = array<i64: 128, 128>}, {pipeline_mode = #tpu.pipeline_mode<synchronous>, transform_indices = @transform_6, window_bounds = array<i64: 1, 128>}, {pipeline_mode = #tpu.pipeline_mode<synchronous>, transform_indices = @transform_7, window_bounds = array<i64: 1, 128>}, {pipeline_mode = #tpu.pipeline_mode<synchronous>, transform_indices = @transform_8, window_bounds = array<i64: 1, 128>}, {pipeline_mode = #tpu.pipeline_mode<synchronous>, transform_indices = @transform_9, window_bounds = array<i64: 128, 128>}, {pipeline_mode = #tpu.pipeline_mode<synchronous>, transform_indices = @transform_10, window_bounds = array<i64: 1, 128>}, {pipeline_mode = #tpu.pipeline_mode<synchronous>, transform_indices = @transform_11, window_bounds = array<i64: 1, 128>}, {pipeline_mode = #tpu.pipeline_mode<synchronous>, transform_indices = @transform_12, window_bounds = array<i64: 1, 128>}, {transform_indices = @transform_13, window_bounds = array<i64: 16, 128>}]} {
    %c0 = arith.constant 0 : index
    %c0_0 = arith.constant 0 : index
    %0 = vector.load %arg1[%c0, %c0_0] : memref<16x128xf32, #tpu.memory_space<vmem>>, vector<16x128xf32>
    %c0_1 = arith.constant 0 : index
    %c0_2 = arith.constant 0 : index
    %1 = vector.load %arg3[%c0_1, %c0_2] : memref<1x128xf32, #tpu.memory_space<vmem>>, vector<1x128xf32>
    %c0_3 = arith.constant 0 : index
    %c0_4 = arith.constant 0 : index
    %2 = vector.load %arg5[%c0_3, %c0_4] : memref<1x128xf32, #tpu.memory_space<vmem>>, vector<1x128xf32>
    %c0_5 = arith.constant 0 : index
    %c0_6 = arith.constant 0 : index
    %3 = vector.load %arg7[%c0_5, %c0_6] : memref<1x128xf32, #tpu.memory_space<vmem>>, vector<1x128xf32>
    %c0_7 = arith.constant 0 : index
    %c0_8 = arith.constant 0 : index
    %4 = vector.load %arg8[%c0_7, %c0_8] : memref<1x128xf32, #tpu.memory_space<vmem>>, vector<1x128xf32>
    %c0_9 = arith.constant 0 : index
    %c0_10 = arith.constant 0 : index
    %5 = vector.load %arg9[%c0_9, %c0_10] : memref<1x128xf32, #tpu.memory_space<vmem>>, vector<1x128xf32>
    %c0_11 = arith.constant 0 : index
    %c0_12 = arith.constant 0 : index
    %6 = vector.load %arg11[%c0_11, %c0_12] : memref<1x128xf32, #tpu.memory_space<vmem>>, vector<1x128xf32>
    %c0_13 = arith.constant 0 : index
    %c0_14 = arith.constant 0 : index
    %7 = vector.load %arg12[%c0_13, %c0_14] : memref<1x128xf32, #tpu.memory_space<vmem>>, vector<1x128xf32>
    %c0_15 = arith.constant 0 : index
    %c0_16 = arith.constant 0 : index
    %8 = vector.load %arg13[%c0_15, %c0_16] : memref<1x128xf32, #tpu.memory_space<vmem>>, vector<1x128xf32>
    %c0_17 = arith.constant 0 : index
    %c0_18 = arith.constant 0 : index
    %9 = vector.load %arg2[%c0_17, %c0_18] : memref<128x128xf32, #tpu.memory_space<vmem>>, vector<128x128xf32>
    %cst = arith.constant dense<0.000000e+00> : vector<16x128xf32>
    %10 = tpu.matmul %0, %9, %cst {dimension_numbers = #tpu.dot_dimension_numbers<[1], [0], [0], [1], [0, 0, 1, 1], [], []>} : vector<16x128xf32>, vector<128x128xf32>, vector<16x128xf32> -> vector<16x128xf32>
    %11 = vector.broadcast %1 : vector<1x128xf32> to vector<16x128xf32>
    %12 = arith.addf %10, %11 : vector<16x128xf32>
    %cst_19 = arith.constant 0.000000e+00 : f32
    %13 = vector.broadcast %cst_19 : f32 to vector<16x128xf32>
    %14 = arith.cmpf ogt, %12, %13 : vector<16x128xf32>
    %cst_20 = arith.constant 3.000000e-01 : f32
    %15 = vector.broadcast %cst_20 : f32 to vector<16x128xf32>
    %16 = arith.mulf %15, %12 : vector<16x128xf32>
    %17 = arith.select %14, %12, %16 : vector<16x128xi1>, vector<16x128xf32>
    %c0_21 = arith.constant 0 : index
    %c0_22 = arith.constant 0 : index
    %18 = vector.load %arg4[%c0_21, %c0_22] : memref<128x128xf32, #tpu.memory_space<vmem>>, vector<128x128xf32>
    %cst_23 = arith.constant dense<0.000000e+00> : vector<16x128xf32>
    %19 = tpu.matmul %17, %18, %cst_23 {dimension_numbers = #tpu.dot_dimension_numbers<[1], [0], [0], [1], [0, 0, 1, 1], [], []>} : vector<16x128xf32>, vector<128x128xf32>, vector<16x128xf32> -> vector<16x128xf32>
    %20 = vector.broadcast %2 : vector<1x128xf32> to vector<16x128xf32>
    %21 = arith.addf %19, %20 : vector<16x128xf32>
    %cst_24 = arith.constant 5.000000e-01 : f32
    %22 = vector.broadcast %cst_24 : f32 to vector<16x128xf32>
    %23 = arith.mulf %22, %21 : vector<16x128xf32>
    %24 = math.tanh %23 : vector<16x128xf32>
    %cst_25 = arith.constant 5.000000e-01 : f32
    %25 = vector.broadcast %cst_25 : f32 to vector<16x128xf32>
    %26 = arith.mulf %25, %24 : vector<16x128xf32>
    %cst_26 = arith.constant 5.000000e-01 : f32
    %27 = vector.broadcast %cst_26 : f32 to vector<16x128xf32>
    %28 = arith.addf %26, %27 : vector<16x128xf32>
    %29 = arith.mulf %0, %28 : vector<16x128xf32>
    %c0_27 = arith.constant 0 : index
    %c0_28 = arith.constant 0 : index
    %30 = vector.load %arg6[%c0_27, %c0_28] : memref<128x128xf32, #tpu.memory_space<vmem>>, vector<128x128xf32>
    %cst_29 = arith.constant dense<0.000000e+00> : vector<16x128xf32>
    %31 = tpu.matmul %29, %30, %cst_29 {dimension_numbers = #tpu.dot_dimension_numbers<[1], [0], [0], [1], [0, 0, 1, 1], [], []>} : vector<16x128xf32>, vector<128x128xf32>, vector<16x128xf32> -> vector<16x128xf32>
    %32 = vector.broadcast %3 : vector<1x128xf32> to vector<16x128xf32>
    %33 = arith.addf %31, %32 : vector<16x128xf32>
    %cst_30 = arith.constant 0.000000e+00 : f32
    %34 = vector.broadcast %cst_30 : f32 to vector<16x128xf32>
    %35 = arith.cmpf ogt, %33, %34 : vector<16x128xf32>
    %cst_31 = arith.constant 3.000000e-01 : f32
    %36 = vector.broadcast %cst_31 : f32 to vector<16x128xf32>
    %37 = arith.mulf %36, %33 : vector<16x128xf32>
    %38 = arith.select %35, %33, %37 : vector<16x128xi1>, vector<16x128xf32>
    %cst_32 = arith.constant dense<0.000000e+00> : vector<16xf32>
    %39 = vector.multi_reduction <add>, %38, %cst_32 [1] : vector<16x128xf32> to vector<16xf32>
    %40 = vector.shape_cast %39 : vector<16xf32> to vector<16x1xf32>
    %41 = arith.mulf %38, %38 : vector<16x128xf32>
    %cst_33 = arith.constant dense<0.000000e+00> : vector<16xf32>
    %42 = vector.multi_reduction <add>, %41, %cst_33 [1] : vector<16x128xf32> to vector<16xf32>
    %43 = vector.shape_cast %42 : vector<16xf32> to vector<16x1xf32>
    %cst_34 = arith.constant 6.250000e-02 : f32
    %44 = vector.broadcast %cst_34 : f32 to vector<16x1xf32>
    %45 = arith.mulf %40, %44 : vector<16x1xf32>
    %cst_35 = arith.constant 6.250000e-02 : f32
    %46 = vector.broadcast %cst_35 : f32 to vector<16x1xf32>
    %47 = arith.mulf %43, %46 : vector<16x1xf32>
    %48 = arith.mulf %45, %45 : vector<16x1xf32>
    %49 = arith.subf %47, %48 : vector<16x1xf32>
    %cst_36 = arith.constant 0.000000e+00 : f32
    %50 = vector.broadcast %cst_36 : f32 to vector<16x1xf32>
    %51 = arith.maximumf %49, %50 : vector<16x1xf32>
    %cst_37 = arith.constant 9.99999974E-6 : f32
    %52 = vector.broadcast %cst_37 : f32 to vector<16x1xf32>
    %53 = arith.addf %51, %52 : vector<16x1xf32>
    %54 = math.rsqrt %53 : vector<16x1xf32>
    %55 = vector.broadcast %45 : vector<16x1xf32> to vector<16x128xf32>
    %56 = arith.subf %38, %55 : vector<16x128xf32>
    %57 = vector.broadcast %54 : vector<16x1xf32> to vector<16x128xf32>
    %58 = arith.mulf %56, %57 : vector<16x128xf32>
    %59 = vector.broadcast %4 : vector<1x128xf32> to vector<16x128xf32>
    %60 = arith.mulf %58, %59 : vector<16x128xf32>
    %61 = vector.broadcast %5 : vector<1x128xf32> to vector<16x128xf32>
    %62 = arith.addf %60, %61 : vector<16x128xf32>
    %c0_38 = arith.constant 0 : index
    %c0_39 = arith.constant 0 : index
    %63 = vector.load %arg10[%c0_38, %c0_39] : memref<128x128xf32, #tpu.memory_space<vmem>>, vector<128x128xf32>
    %cst_40 = arith.constant dense<0.000000e+00> : vector<16x128xf32>
    %64 = tpu.matmul %62, %63, %cst_40 {dimension_numbers = #tpu.dot_dimension_numbers<[1], [0], [0], [1], [0, 0, 1, 1], [], []>} : vector<16x128xf32>, vector<128x128xf32>, vector<16x128xf32> -> vector<16x128xf32>
    %65 = vector.broadcast %6 : vector<1x128xf32> to vector<16x128xf32>
    %66 = arith.addf %64, %65 : vector<16x128xf32>
    %cst_41 = arith.constant dense<0.000000e+00> : vector<16xf32>
    %67 = vector.multi_reduction <add>, %66, %cst_41 [1] : vector<16x128xf32> to vector<16xf32>
    %68 = vector.shape_cast %67 : vector<16xf32> to vector<16x1xf32>
    %69 = arith.mulf %66, %66 : vector<16x128xf32>
    %cst_42 = arith.constant dense<0.000000e+00> : vector<16xf32>
    %70 = vector.multi_reduction <add>, %69, %cst_42 [1] : vector<16x128xf32> to vector<16xf32>
    %71 = vector.shape_cast %70 : vector<16xf32> to vector<16x1xf32>
    %cst_43 = arith.constant 6.250000e-02 : f32
    %72 = vector.broadcast %cst_43 : f32 to vector<16x1xf32>
    %73 = arith.mulf %68, %72 : vector<16x1xf32>
    %cst_44 = arith.constant 6.250000e-02 : f32
    %74 = vector.broadcast %cst_44 : f32 to vector<16x1xf32>
    %75 = arith.mulf %71, %74 : vector<16x1xf32>
    %76 = arith.mulf %73, %73 : vector<16x1xf32>
    %77 = arith.subf %75, %76 : vector<16x1xf32>
    %cst_45 = arith.constant 0.000000e+00 : f32
    %78 = vector.broadcast %cst_45 : f32 to vector<16x1xf32>
    %79 = arith.maximumf %77, %78 : vector<16x1xf32>
    %cst_46 = arith.constant 9.99999974E-6 : f32
    %80 = vector.broadcast %cst_46 : f32 to vector<16x1xf32>
    %81 = arith.addf %79, %80 : vector<16x1xf32>
    %82 = math.rsqrt %81 : vector<16x1xf32>
    %83 = vector.broadcast %73 : vector<16x1xf32> to vector<16x128xf32>
    %84 = arith.subf %66, %83 : vector<16x128xf32>
    %85 = vector.broadcast %82 : vector<16x1xf32> to vector<16x128xf32>
    %86 = arith.mulf %84, %85 : vector<16x128xf32>
    %87 = vector.broadcast %7 : vector<1x128xf32> to vector<16x128xf32>
    %88 = arith.mulf %86, %87 : vector<16x128xf32>
    %89 = vector.broadcast %8 : vector<1x128xf32> to vector<16x128xf32>
    %90 = arith.addf %88, %89 : vector<16x128xf32>
    %c0_47 = arith.constant 0 : index
    %c0_48 = arith.constant 0 : index
    %91 = vector.load %arg14[%c0_47, %c0_48] : memref<16x128xf32, #tpu.memory_space<vmem>>, vector<16x128xf32>
    tpu.vector_store %arg14[%c0_47, %c0_48], %90 {strides = array<i32>} : memref<16x128xf32, #tpu.memory_space<vmem>>, vector<16x128xf32>,
    return
  }
  func.func @transform_0(%arg0: i32) -> (i32, i32) {
    %c0_i32 = arith.constant 0 : i32
    %c0_i32_0 = arith.constant 0 : i32
    return %arg0, %c0_i32 : i32, i32
  }
  func.func @transform_1(%arg0: i32) -> (i32, i32) {
    %c0_i32 = arith.constant 0 : i32
    %c0_i32_0 = arith.constant 0 : i32
    %c0_i32_1 = arith.constant 0 : i32
    return %c0_i32, %c0_i32_0 : i32, i32
  }
  func.func @transform_2(%arg0: i32) -> (i32, i32) {
    %c0_i32 = arith.constant 0 : i32
    %c0_i32_0 = arith.constant 0 : i32
    %c0_i32_1 = arith.constant 0 : i32
    return %c0_i32, %c0_i32_0 : i32, i32
  }
  func.func @transform_3(%arg0: i32) -> (i32, i32) {
    %c0_i32 = arith.constant 0 : i32
    %c0_i32_0 = arith.constant 0 : i32
    %c0_i32_1 = arith.constant 0 : i32
    return %c0_i32, %c0_i32_0 : i32, i32
  }
  func.func @transform_4(%arg0: i32) -> (i32, i32) {
    %c0_i32 = arith.constant 0 : i32
    %c0_i32_0 = arith.constant 0 : i32
    %c0_i32_1 = arith.constant 0 : i32
    return %c0_i32, %c0_i32_0 : i32, i32
  }
  func.func @transform_5(%arg0: i32) -> (i32, i32) {
    %c0_i32 = arith.constant 0 : i32
    %c0_i32_0 = arith.constant 0 : i32
    %c0_i32_1 = arith.constant 0 : i32
    return %c0_i32, %c0_i32_0 : i32, i32
  }
  func.func @transform_6(%arg0: i32) -> (i32, i32) {
    %c0_i32 = arith.constant 0 : i32
    %c0_i32_0 = arith.constant 0 : i32
    %c0_i32_1 = arith.constant 0 : i32
    return %c0_i32, %c0_i32_0 : i32, i32
  }
  func.func @transform_7(%arg0: i32) -> (i32, i32) {
    %c0_i32 = arith.constant 0 : i32
    %c0_i32_0 = arith.constant 0 : i32
    %c0_i32_1 = arith.constant 0 : i32
    return %c0_i32, %c0_i32_0 : i32, i32
  }
  func.func @transform_8(%arg0: i32) -> (i32, i32) {
    %c0_i32 = arith.constant 0 : i32
    %c0_i32_0 = arith.constant 0 : i32
    %c0_i32_1 = arith.constant 0 : i32
    return %c0_i32, %c0_i32_0 : i32, i32
  }
  func.func @transform_9(%arg0: i32) -> (i32, i32) {
    %c0_i32 = arith.constant 0 : i32
    %c0_i32_0 = arith.constant 0 : i32
    %c0_i32_1 = arith.constant 0 : i32
    return %c0_i32, %c0_i32_0 : i32, i32
  }
  func.func @transform_10(%arg0: i32) -> (i32, i32) {
    %c0_i32 = arith.constant 0 : i32
    %c0_i32_0 = arith.constant 0 : i32
    %c0_i32_1 = arith.constant 0 : i32
    return %c0_i32, %c0_i32_0 : i32, i32
  }
  func.func @transform_11(%arg0: i32) -> (i32, i32) {
    %c0_i32 = arith.constant 0 : i32
    %c0_i32_0 = arith.constant 0 : i32
    %c0_i32_1 = arith.constant 0 : i32
    return %c0_i32, %c0_i32_0 : i32, i32
  }
  func.func @transform_12(%arg0: i32) -> (i32, i32) {
    %c0_i32 = arith.constant 0 : i32
    %c0_i32_0 = arith.constant 0 : i32
    %c0_i32_1 = arith.constant 0 : i32
    return %c0_i32, %c0_i32_0 : i32, i32
  }
  func.func @transform_13(%arg0: i32) -> (i32, i32) {
    %c0_i32 = arith.constant 0 : i32
    %c0_i32_0 = arith.constant 0 : i32
    return %arg0, %c0_i32 : i32, i32
  }
}

</mosaic_0001>

<bundles_post_ra>
// kernel: tpu_custom_call.1
= control target key start
LH: loop header
LB: loop body
LE: loop exit
PB: predicated region body
PF: predicated region fallthrough
CT: control target
= control target key end

     0   :  { %18 = vsyncpa [#allocation3], 0  ;;  %s796_s0 = inlined_call_operand.hbm [shape: f32[16,128], index: 0, kind: input, shape index: {}]   ;;  %s797_s1 = inlined_call_operand.hbm [shape: f32[128,128], index: 1, kind: input, shape index: {}]   ;;  %s798_s2 = inlined_call_operand.vmem [shape: f32[1,128], index: 2, kind: input, shape index: {}]   ;;  %s799_s3 = inlined_call_operand.hbm [shape: f32[128,128], index: 3, kind: input, shape index: {}]   ;;  %s800_s4 = inlined_call_operand.vmem [shape: f32[1,128], index: 4, kind: input, shape index: {}]   ;;  %s801_s5 = inlined_call_operand.hbm [shape: f32[128,128], index: 5, kind: input, shape index: {}]   ;;  %s802_s6 = inlined_call_operand.vmem [shape: f32[1,128], index: 6, kind: input, shape index: {}]   ;;  %s803_s7 = inlined_call_operand.vmem [shape: f32[1,128], index: 7, kind: input, shape index: {}]   ;;  %s804_s8 = inlined_call_operand.vmem [shape: f32[1,128], index: 8, kind: input, shape index: {}]   ;;  %s805_s9 = inlined_call_operand.hbm [shape: f32[128,128], index: 9, kind: input, shape index: {}]   ;;  %s806_s10 = inlined_call_operand.vmem [shape: f32[1,128], index: 10, kind: input, shape index: {}]   ;;  %s807_s11 = inlined_call_operand.vmem [shape: f32[1,128], index: 11, kind: input, shape index: {}]   ;;  %s808_s12 = inlined_call_operand.vmem [shape: f32[1,128], index: 12, kind: input, shape index: {}]   ;;  %s809_s13 = inlined_call_operand.hbm [shape: f32[16,128], index: 13, kind: output, shape index: {}]  }
   0x1   :  { %19 = vsyncpa [#allocation6], 0 }
   0x2   :  { %20 = vsyncpa [#allocation9], 0 }
   0x3   :  { %21 = vsyncpa [#allocation4], 0  ;;  %s39_s27 = sshll.u32 %s797_s1, 4  ;;  %s638_s28 = smov [#allocation5]   ;;  %s40_s27 = int_to_ptr.hbm [resolvable:$true] %s39_s27 }
   0x4   :  { %s41_s29 = sshll.u32 %s638_s28, 4  ;;  %s69_s15 = sshll.u32 %s801_s5, 4  ;;  %s42_s29 = int_to_ptr.vmem [resolvable:$true] %s41_s29  ;;  %s70_s15 = int_to_ptr.hbm [resolvable:$true] %s69_s15 }
   0x5   :  { %s639_s16 = smov 128   ;;  %s640_s17 = smov 8  }
   0x6   :  { %47 = dma.hbm_to_vmem [thread:$0]  %s40_s27, 2048, %s42_s29, [#allocation6], %s639_s16, %s639_s16, %s640_s17  }
   0x7   :  { %s641_s18 = smov [#allocation8]   ;;  %s26_s1 = sshll.u32 %s796_s0, 4  ;;  %s27_s1 = int_to_ptr.hbm [resolvable:$true] %s26_s1 }
   0x8   :  { %s71_s19 = sshll.u32 %s641_s18, 4  ;;  %s54_s23 = sshll.u32 %s799_s3, 4  ;;  %s72_s19 = int_to_ptr.vmem [resolvable:$true] %s71_s19  ;;  %s55_s23 = int_to_ptr.hbm [resolvable:$true] %s54_s23 }
   0x9   :  { %77 = dma.hbm_to_vmem [thread:$0]  %s70_s15, 2048, %s72_s19, [#allocation9], %s639_s16, %s639_s16, %s640_s17  }
   0xa   :  { %s642_s24 = smov [#allocation2]   ;;  %s643_s26 = smov [#allocation7]  }
   0xb   :  { %s28_s25 = sshll.u32 %s642_s24, 4  ;;  %s56_s0 = sshll.u32 %s643_s26, 4  ;;  %s29_s25 = int_to_ptr.vmem [resolvable:$true] %s28_s25  ;;  %s57_s0 = int_to_ptr.vmem [resolvable:$true] %s56_s0 }
   0xc   :  { %34 = dma.hbm_to_vmem [thread:$0]  %s27_s1, 256, %s29_s25, [#allocation3], %s639_s16, %s639_s16, %s640_s17  }
   0xd   :  { %s88_s29 = sshll.u32 %s805_s9, 4  ;;  %s644_s3 = smov [#allocation10]   ;;  %s89_s29 = int_to_ptr.hbm [resolvable:$true] %s88_s29 }
   0xe   :  { %62 = dma.hbm_to_vmem [thread:$0]  %s55_s23, 2048, %s57_s0, [#allocation6], %s639_s16, %s639_s16, %s640_s17  }
   0xf   :  { %s90_s30 = sshll.u32 %s644_s3, 4  ;;  %s91_s30 = int_to_ptr.vmem [resolvable:$true] %s90_s30 }
  0x10   :  { %96 = dma.hbm_to_vmem [thread:$0]  %s89_s29, 2048, %s91_s30, [#allocation9], %s639_s16, %s639_s16, %s640_s17  }
  0x11   :  { %630 = dma.done.wait [#allocation3], 256  }
  0x12   :  { %631 = vsyncadd [#allocation3], 4294967040 }
  0x13   :  { %632 = dma.done.wait [#allocation6], 4096  }
  0x14   :  { %633 = vsyncadd [#allocation6], 4294963200 }
  0x15   :  { %634 = dma.done.wait [#allocation9], 4096  }
  0x16   :  { %635 = vsyncadd [#allocation9], 4294963200  ;;  %v148_v0 = vld [vmem:[#allocation5 + $0x78] sm:$0xff]  ;;  %v147_v1 = vld [vmem:[#allocation5 + $0x70] sm:$0xff]  ;;  %s443_s26 = sshll.u32 %s809_s13, 4  ;;  %s444_s26 = int_to_ptr.hbm [resolvable:$true] %s443_s26 }
  0x17   :  { %152 = vmatpush.msra.mxu0 %v148_v0  ;;  %v146_v2 = vld [vmem:[#allocation5 + $0x68] sm:$0xff]  ;;  %v145_v3 = vld [vmem:[#allocation5 + $0x60] sm:$0xff]  ;;  %v144_v4 = vld [vmem:[#allocation5 + $0x58] sm:$0xff] }
  0x18   :  { %v143_v5 = vld [vmem:[#allocation5 + $0x50] sm:$0xff]  ;;  %v196_v6 = vld [vmem:[#allocation7 + $0x78] sm:$0xff]  ;;  %v142_v8 = vld [vmem:[#allocation5 + $0x48] sm:$0xff] }
  0x19   :  { %153 = vmatpush.msra.mxu0 %v147_v1  ;;  %v195_v7 = vld [vmem:[#allocation7 + $0x70] sm:$0xff]  ;;  %200 = vmatpush.msra.mxu1 %v196_v6  ;;  %v194_v9 = vld [vmem:[#allocation7 + $0x68] sm:$0xff]  ;;  %v141_v10 = vld [vmem:[#allocation5 + $0x40] sm:$0xff] }
  0x1a   :  { %v193_v11 = vld [vmem:[#allocation7 + $0x60] sm:$0xff]  ;;  %v140_v12 = vld [vmem:[#allocation5 + $0x38] sm:$0xff]  ;;  %v139_v14 = vld [vmem:[#allocation5 + $0x30] sm:$0xff] }
  0x1b   :  { %154 = vmatpush.msra.mxu0 %v146_v2  ;;  %201 = vmatpush.msra.mxu1 %v195_v7  ;;  %v192_v13 = vld [vmem:[#allocation7 + $0x58] sm:$0xff]  ;;  %v191_v15 = vld [vmem:[#allocation7 + $0x50] sm:$0xff]  ;;  %v138_v16 = vld [vmem:[#allocation5 + $0x28] sm:$0xff] }
  0x1c   :  { %v190_v17 = vld [vmem:[#allocation7 + $0x48] sm:$0xff]  ;;  %v137_v18 = vld [vmem:[#allocation5 + $0x20] sm:$0xff]  ;;  %v136_v20 = vld [vmem:[#allocation5 + $0x18] sm:$0xff] }
  0x1d   :  { %155 = vmatpush.msra.mxu0 %v145_v3  ;;  %202 = vmatpush.msra.mxu1 %v194_v9  ;;  %v189_v19 = vld [vmem:[#allocation7 + $0x40] sm:$0xff]  ;;  %v188_v21 = vld [vmem:[#allocation7 + $0x38] sm:$0xff]  ;;  %v135_v22 = vld [vmem:[#allocation5 + $0x10] sm:$0xff] }
  0x1e   :  { %v187_v23 = vld [vmem:[#allocation7 + $0x30] sm:$0xff]  ;;  %v134_v24 = vld [vmem:[#allocation5 + $0x8] sm:$0xff]  ;;  %v133_v26 = vld [vmem:[#allocation5] sm:$0xff] }
  0x1f   :  { %156 = vmatpush.msra.mxu0 %v144_v4  ;;  %203 = vmatpush.msra.mxu1 %v193_v11  ;;  %v186_v25 = vld [vmem:[#allocation7 + $0x28] sm:$0xff]  ;;  %v185_v27 = vld [vmem:[#allocation7 + $0x20] sm:$0xff]  ;;  %v746_v28 = vld [vmem:[#allocation2] sm:$0xff] }
  0x20   :  { %v184_v29 = vld [vmem:[#allocation7 + $0x18] sm:$0xff]  ;;  %v183_v31 = vld [vmem:[#allocation7 + $0x10] sm:$0xff]  ;;  %v182_v32 = vld [vmem:[#allocation7 + $0x8] sm:$0xff] }
  0x21   :  { %157 = vmatpush.msra.mxu0 %v143_v5  ;;  %204 = vmatpush.msra.mxu1 %v192_v13  ;;  %v749_v30 = vld [vmem:[#allocation2 + $0x8] sm:$0xff]  ;;  %v181_v33 = vld [vmem:[#allocation7] sm:$0xff]  ;;  %v247_v35 = vld [vmem:[#allocation8 + $0x70] sm:$0xff] }
  0x22   :  { %v248_v34 = vld [vmem:[#allocation8 + $0x78] sm:$0xff]  ;;  %v246_v36 = vld [vmem:[#allocation8 + $0x68] sm:$0xff]  ;;  %v245_v37 = vld [vmem:[#allocation8 + $0x60] sm:$0xff] }
  0x23   :  { %158 = vmatpush.msra.mxu0 %v142_v8  ;;  %205 = vmatpush.msra.mxu1 %v191_v15  ;;  %v244_v38 = vld [vmem:[#allocation8 + $0x58] sm:$0xff]  ;;  %v243_v39 = vld [vmem:[#allocation8 + $0x50] sm:$0xff]  ;;  %v242_v40 = vld [vmem:[#allocation8 + $0x48] sm:$0xff] }
  0x24   :  { %252 = vmatpush.msra.mxu2 %v248_v34  ;;  %v466_v41 = vld [vmem:[%s798_s2] ss:$0 sm:$0xff]  ;;  %v241_v50 = vld [vmem:[#allocation8 + $0x40] sm:$0xff]  ;;  %v240_v51 = vld [vmem:[#allocation8 + $0x38] sm:$0xff] }
  0x25   :  { %159 = vmatpush.msra.mxu0 %v141_v10  ;;  %206 = vmatpush.msra.mxu1 %v190_v17  ;;  %v239_v52 = vld [vmem:[#allocation8 + $0x30] sm:$0xff]  ;;  %v238_v53 = vld [vmem:[#allocation8 + $0x28] sm:$0xff]  ;;  %v237_v54 = vld [vmem:[#allocation8 + $0x20] sm:$0xff] }
  0x26   :  { %253 = vmatpush.msra.mxu2 %v247_v35  ;;  %v236_v55 = vld [vmem:[#allocation8 + $0x18] sm:$0xff]  ;;  %v235_v56 = vld [vmem:[#allocation8 + $0x10] sm:$0xff]  ;;  %v234_v57 = vld [vmem:[#allocation8 + $0x8] sm:$0xff] }
  0x27   :  { %160 = vmatpush.msra.mxu0 %v140_v12  ;;  %207 = vmatpush.msra.mxu1 %v189_v19  ;;  %v233_v58 = vld [vmem:[#allocation8] sm:$0xff]  ;;  %v467_v59 = vld [vmem:[%s800_s4] ss:$0 sm:$0xff]  ;;  %v340_v34 = vld [vmem:[#allocation10 + $0x18] sm:$0xff] }
  0x28   :  { %254 = vmatpush.msra.mxu2 %v246_v36  ;;  %v468_v10 = vld [vmem:[%s802_s6] ss:$0 sm:$0xff] }
  0x29   :  { %161 = vmatpush.msra.mxu0 %v139_v14  ;;  %208 = vmatpush.msra.mxu1 %v188_v21  ;;  %v352_v21 = vld [vmem:[#allocation10 + $0x78] sm:$0xff]  ;;  %v339_v35 = vld [vmem:[#allocation10 + $0x10] sm:$0xff] }
  0x2a   :  { %255 = vmatpush.msra.mxu2 %v245_v37  ;;  %356 = vmatpush.msra.mxu3 %v352_v21  ;;  %v338_v37 = vld [vmem:[#allocation10 + $0x8] sm:$0xff] }
  0x2b   :  { %162 = vmatpush.msra.mxu0 %v138_v16  ;;  %209 = vmatpush.msra.mxu1 %v187_v23  ;;  %v350_v23 = vld [vmem:[#allocation10 + $0x68] sm:$0xff] }
  0x2c   :  { %256 = vmatpush.msra.mxu2 %v244_v38  ;;  %v337_v38 = vld [vmem:[#allocation10] sm:$0xff] }
  0x2d   :  { %163 = vmatpush.msra.mxu0 %v137_v18  ;;  %210 = vmatpush.msra.mxu1 %v186_v25  ;;  %v348_v25 = vld [vmem:[#allocation10 + $0x58] sm:$0xff] }
  0x2e   :  { %257 = vmatpush.msra.mxu2 %v243_v39 }
  0x2f   :  { %164 = vmatpush.msra.mxu0 %v136_v20  ;;  %211 = vmatpush.msra.mxu1 %v185_v27  ;;  %v346_v27 = vld [vmem:[#allocation10 + $0x48] sm:$0xff] }
  0x30   :  { %258 = vmatpush.msra.mxu2 %v242_v40 }
  0x31   :  { %165 = vmatpush.msra.mxu0 %v135_v22  ;;  %212 = vmatpush.msra.mxu1 %v184_v29  ;;  %v351_v22 = vld [vmem:[#allocation10 + $0x70] sm:$0xff]  ;;  %v344_v29 = vld [vmem:[#allocation10 + $0x38] sm:$0xff] }
  0x32   :  { %259 = vmatpush.msra.mxu2 %v241_v50  ;;  %357 = vmatpush.msra.mxu3 %v351_v22 }
  0x33   :  { %166 = vmatpush.msra.mxu0 %v134_v24  ;;  %213 = vmatpush.msra.mxu1 %v183_v31  ;;  %v349_v24 = vld [vmem:[#allocation10 + $0x60] sm:$0xff]  ;;  %v342_v31 = vld [vmem:[#allocation10 + $0x28] sm:$0xff] }
  0x34   :  { %260 = vmatpush.msra.mxu2 %v240_v51  ;;  %358 = vmatpush.msra.mxu3 %v350_v23 }
  0x35   :  { %167 = vmatpush.msra.mxu0 %v133_v26  ;;  %214 = vmatpush.msra.mxu1 %v182_v32  ;;  %v347_v26 = vld [vmem:[#allocation10 + $0x50] sm:$0xff]  ;;  %v341_v32 = vld [vmem:[#allocation10 + $0x20] sm:$0xff] }
  0x36   :  { %168 = vmatmul.f32.vlgmr.msra.gmra.mxu0 %v746_v28  ;;  %261 = vmatpush.msra.mxu2 %v239_v52 }
  0x37   :  { %215 = vmatpush.msra.mxu1 %v181_v33  ;;  %359 = vmatpush.msra.mxu3 %v349_v24 }
  0x38   :  { %262 = vmatpush.msra.mxu2 %v238_v53 }
  0x39   :  { %360 = vmatpush.msra.mxu3 %v348_v25 }
  0x3a   :  { %263 = vmatpush.msra.mxu2 %v237_v54 }
  0x3b   :  { %361 = vmatpush.msra.mxu3 %v347_v26 }
  0x3c   :  { %264 = vmatpush.msra.mxu2 %v236_v55 }
  0x3d   :  { %362 = vmatpush.msra.mxu3 %v346_v27 }
  0x3e   :  { %171 = vmatmul.f32.gmra.mxu0 %v749_v30  ;;  %265 = vmatpush.msra.mxu2 %v235_v56 }
  0x40   :  { %266 = vmatpush.msra.mxu2 %v234_v57 }
  0x42   :  { %267 = vmatpush.msra.mxu2 %v233_v58 }
  0xb3   :  { %v169_v42 = vpop.f32.mrf.mxu0 }
  0xb4   :  { %v170_v43 = vadd.f32 %v466_v41, %v169_v42 }
  0xb6   :  { %vm175_vm0 = vcmp.gt.f32.partialorder %v170_v43, 0.0  ;;  %v177_v44 = vmul.f32 0.3, %v170_v43 }
  0xb8   :  { %v179_v45 = vsel %vm175_vm0, %v170_v43, %v177_v44 }
  0xb9   :  { %216 = vmatmul.f32.vlgmr.msra.gmra.mxu1 %v179_v45 }
  0xbb   :  { %v172_v46 = vpop.f32.mrf.mxu0 }
  0xbc   :  { %v173_v47 = vadd.f32 %v466_v41, %v172_v46 }
  0xbe   :  { %vm176_vm1 = vcmp.gt.f32.partialorder %v173_v47, 0.0  ;;  %v178_v48 = vmul.f32 0.3, %v173_v47 }
  0xc0   :  { %v180_v49 = vsel %vm176_vm1, %v173_v47, %v178_v48 }
  0xc1   :  { %219 = vmatmul.f32.gmra.mxu1 %v180_v49 }
 0x136   :  { %v217_v60 = vpop.f32.mrf.mxu1 }
 0x137   :  { %v218_v61 = vadd.f32 %v467_v59, %v217_v60 }
 0x139   :  { %v223_v62 = vmul.f32 0.5, %v218_v61 }
 0x13b   :  { %474 = vtanh.f32 %v223_v62  ;;  %v469_v62 = vld [vmem:[%s803_s7] ss:$0 sm:$0xff] }
 0x13e   :  { %v220_v63 = vpop.f32.mrf.mxu1 }
 0x13f   :  { %v221_v0 = vadd.f32 %v467_v59, %v220_v63 }
 0x141   :  { %v475_v1 = vpop.eup %474  ;;  %v224_v2 = vmul.f32 0.5, %v221_v0 }
 0x142   :  { %v227_v3 = vmul.f32 0.5, %v475_v1 }
 0x143   :  { %476 = vtanh.f32 %v224_v2  ;;  %v470_v2 = vld [vmem:[%s804_s8] ss:$0 sm:$0xff] }
 0x144   :  { %v229_v4 = vadd.f32 0.5, %v227_v3 }
 0x146   :  { %v231_v5 = vmul.f32 %v229_v4, %v746_v28  ;;  %v345_v28 = vld [vmem:[#allocation10 + $0x40] sm:$0xff] }
 0x147   :  { %363 = vmatpush.msra.mxu3 %v345_v28 }
 0x148   :  { %268 = vmatmul.f32.vlgmr.msra.gmra.mxu2 %v231_v5 }
 0x149   :  { %v477_v6 = vpop.eup %476  ;;  %364 = vmatpush.msra.mxu3 %v344_v29 }
 0x14a   :  { %v228_v7 = vmul.f32 0.5, %v477_v6 }
 0x14c   :  { %v230_v8 = vadd.f32 0.5, %v228_v7 }
 0x14e   :  { %v232_v9 = vmul.f32 %v230_v8, %v749_v30  ;;  %v343_v30 = vld [vmem:[#allocation10 + $0x30] sm:$0xff] }
 0x14f   :  { %365 = vmatpush.msra.mxu3 %v343_v30 }
 0x150   :  { %271 = vmatmul.f32.gmra.mxu2 %v232_v9 }
 0x151   :  { %366 = vmatpush.msra.mxu3 %v342_v31 }
 0x153   :  { %367 = vmatpush.msra.mxu3 %v341_v32 }
 0x155   :  { %368 = vmatpush.msra.mxu3 %v340_v34 }
 0x157   :  { %369 = vmatpush.msra.mxu3 %v339_v35 }
 0x159   :  { %370 = vmatpush.msra.mxu3 %v338_v37 }
 0x15b   :  { %371 = vmatpush.msra.mxu3 %v337_v38 }
 0x1cb   :  { %v269_v11 = vpop.f32.mrf.mxu2 }
 0x1cc   :  { %v270_v12 = vadd.f32 %v468_v10, %v269_v11 }
 0x1ce   :  { %v277_v13 = vmul.f32 0.3, %v270_v12  ;;  %vm275_vm2 = vcmp.gt.f32.partialorder %v270_v12, 0.0 }
 0x1d0   :  { %v763_v14 = vsel %vm275_vm2, %v270_v12, %v277_v13  ;;  %v471_v13 = vld [vmem:[%s806_s10] ss:$0 sm:$0xff] }
 0x1d1   :  { %281 = vadd.xlane.f32.xlu0 %v763_v14  ;;  %v285_v18 = vmul.f32 %v763_v14, %v763_v14 }
 0x1d3   :  { %v272_v15 = vpop.f32.mrf.mxu2 }
 0x1d4   :  { %v273_v16 = vadd.f32 %v468_v10, %v272_v15 }
 0x1d6   :  { %v278_v17 = vmul.f32 0.3, %v273_v16  ;;  %vm276_vm3 = vcmp.gt.f32.partialorder %v273_v16, 0.0 }
 0x1d8   :  { %v768_v19 = vsel %vm276_vm3, %v273_v16, %v278_v17 }
 0x1d9   :  { %283 = vadd.xlane.f32.xlu1 %v768_v19  ;;  %287 = vadd.xlane.f32.xlu0 %v285_v18  ;;  %v286_v20 = vmul.f32 %v768_v19, %v768_v19 }
 0x1e1   :  { %289 = vadd.xlane.f32.xlu1 %v286_v20 }
 0x244   :  { %v282_v33 = vpop.xlane.xlu0 %281 }
 0x245   :  { %v291_v36 = vmul.f32 0.0625, %v282_v33 }
 0x247   :  { %v295_v41 = vmul.f32 %v291_v36, %v291_v36  ;;  %v323_v61 = vsub.f32 %v763_v14, %v291_v36 }
 0x24c   :  { %v284_v39 = vpop.xlane.xlu1 %283  ;;  %v288_v40 = vpop.xlane.xlu0 %287 }
 0x24d   :  { %v293_v42 = vmul.f32 0.0625, %v288_v40  ;;  %v292_v44 = vmul.f32 0.0625, %v284_v39 }
 0x24f   :  { %v297_v43 = vsub.f32 %v293_v42, %v295_v41  ;;  %v296_v48 = vmul.f32 %v292_v44, %v292_v44  ;;  %v324_v8 = vsub.f32 %v768_v19, %v292_v44 }
 0x251   :  { %v299_v45 = vmax.f32 %v297_v43, 0.0 }
 0x253   :  { %v301_v46 = vadd.f32 1e-05, %v299_v45  ;;  %v472_v45 = vld [vmem:[%s807_s11] ss:$0 sm:$0xff]  ;;  %s645_s11 = smov [#allocation11]  }
 0x254   :  { %v290_v47 = vpop.xlane.xlu1 %289  ;;  %s441_s23 = sshll.u32 %s645_s11, 4  ;;  %s442_s23 = int_to_ptr.vmem [resolvable:$true] %s441_s23 }
 0x255   :  { %478 = vrsqrt.f32 %v301_v46  ;;  %v294_v49 = vmul.f32 0.0625, %v290_v47  ;;  %vm309_vm5 = vweird.f32 %v301_v46 }
 0x257   :  { %v298_v50 = vsub.f32 %v294_v49, %v296_v48  ;;  %v473_v49 = vld [vmem:[%s808_s12] ss:$0 sm:$0xff] }
 0x259   :  { %v300_v51 = vmax.f32 %v298_v50, 0.0 }
 0x25b   :  { %v479_v52 = vpop.eup %478  ;;  %v302_v53 = vadd.f32 1e-05, %v300_v51 }
 0x25c   :  { %v304_v54 = vmul.f32 %v479_v52, %v301_v46  ;;  %vm310_vm4 = vweird.f32 %v479_v52 }
 0x25d   :  { %480 = vrsqrt.f32 %v302_v53  ;;  %vm311_vm6 = vmor %vm309_vm5, %vm310_vm4  ;;  %vm319_vm8 = vweird.f32 %v302_v53 }
 0x25e   :  { %v305_v55 = vmul.f32 %v479_v52, %v304_v54 }
 0x260   :  { %v306_v56 = vmul.f32 0.5, %v305_v55 }
 0x262   :  { %v307_v57 = vsub.f32 1.5, %v306_v56 }
 0x263   :  { %v481_v58 = vpop.eup %480 }
 0x264   :  { %v314_v59 = vmul.f32 %v481_v58, %v302_v53  ;;  %v308_v60 = vmul.f32 %v479_v52, %v307_v57  ;;  %vm320_vm7 = vweird.f32 %v481_v58 }
 0x265   :  { %vm321_vm9 = vmor %vm319_vm8, %vm320_vm7 }
 0x266   :  { %v315_v63 = vmul.f32 %v481_v58, %v314_v59  ;;  %v312_v0 = vsel %vm311_vm6, %v479_v52, %v308_v60 }
 0x267   :  { %v325_v1 = vmul.f32 %v323_v61, %v312_v0 }
 0x268   :  { %v316_v3 = vmul.f32 0.5, %v315_v63 }
 0x269   :  { %v330_v4 = vmul.f32 %v469_v62, %v325_v1 }
 0x26a   :  { %v317_v5 = vsub.f32 1.5, %v316_v3 }
 0x26b   :  { %v335_v6 = vadd.f32 %v470_v2, %v330_v4 }
 0x26c   :  { %v318_v7 = vmul.f32 %v481_v58, %v317_v5 }
 0x26d   :  { %372 = vmatmul.f32.vlgmr.msra.gmra.mxu3 %v335_v6 }
 0x26e   :  { %v322_v9 = vsel %vm321_vm9, %v481_v58, %v318_v7 }
 0x26f   :  { %v326_v10 = vmul.f32 %v324_v8, %v322_v9 }
 0x271   :  { %v331_v11 = vmul.f32 %v469_v62, %v326_v10 }
 0x273   :  { %v336_v12 = vadd.f32 %v470_v2, %v331_v11 }
 0x275   :  { %375 = vmatmul.f32.gmra.mxu3 %v336_v12 }
 0x2f0   :  { %v373_v14 = vpop.f32.mrf.mxu3 }
 0x2f1   :  { %v374_v15 = vadd.f32 %v471_v13, %v373_v14 }
 0x2f3   :  { %379 = vadd.xlane.f32.xlu2 %v374_v15  ;;  %v383_v16 = vmul.f32 %v374_v15, %v374_v15 }
 0x2f5   :  { %385 = vadd.xlane.f32.xlu0 %v383_v16 }
 0x2f8   :  { %v376_v17 = vpop.f32.mrf.mxu3 }
 0x2f9   :  { %v377_v18 = vadd.f32 %v471_v13, %v376_v17 }
 0x2fb   :  { %381 = vadd.xlane.f32.xlu2 %v377_v18  ;;  %v384_v19 = vmul.f32 %v377_v18, %v377_v18 }
 0x2fd   :  { %387 = vadd.xlane.f32.xlu1 %v384_v19 }
 0x366   :  { %v380_v20 = vpop.xlane.xlu2 %379 }
 0x367   :  { %v389_v21 = vmul.f32 0.0625, %v380_v20 }
 0x368   :  { %v386_v22 = vpop.xlane.xlu0 %385 }
 0x369   :  { %v393_v23 = vmul.f32 %v389_v21, %v389_v21  ;;  %v391_v24 = vmul.f32 0.0625, %v386_v22  ;;  %v421_v43 = vsub.f32 %v374_v15, %v389_v21 }
 0x36b   :  { %v395_v25 = vsub.f32 %v391_v24, %v393_v23 }
 0x36d   :  { %v397_v26 = vmax.f32 %v395_v25, 0.0 }
 0x36e   :  { %v382_v27 = vpop.xlane.xlu2 %381 }
 0x36f   :  { %v399_v28 = vadd.f32 1e-05, %v397_v26  ;;  %v390_v29 = vmul.f32 0.0625, %v382_v27 }
 0x370   :  { %v388_v30 = vpop.xlane.xlu1 %387 }
 0x371   :  { %482 = vrsqrt.f32 %v399_v28  ;;  %v394_v31 = vmul.f32 %v390_v29, %v390_v29  ;;  %v392_v32 = vmul.f32 0.0625, %v388_v30  ;;  %vm407_vm11 = vweird.f32 %v399_v28 }
 0x372   :  { %v422_v55 = vsub.f32 %v377_v18, %v390_v29 }
 0x373   :  { %v396_v33 = vsub.f32 %v392_v32, %v394_v31 }
 0x375   :  { %v398_v34 = vmax.f32 %v396_v33, 0.0 }
 0x377   :  { %v483_v35 = vpop.eup %482  ;;  %v400_v37 = vadd.f32 1e-05, %v398_v34 }
 0x378   :  { %v402_v36 = vmul.f32 %v483_v35, %v399_v28  ;;  %vm408_vm10 = vweird.f32 %v483_v35 }
 0x379   :  { %484 = vrsqrt.f32 %v400_v37  ;;  %vm409_vm12 = vmor %vm407_vm11, %vm408_vm10  ;;  %vm417_vm14 = vweird.f32 %v400_v37 }
 0x37a   :  { %v403_v38 = vmul.f32 %v483_v35, %v402_v36 }
 0x37c   :  { %v404_v39 = vmul.f32 0.5, %v403_v38 }
 0x37e   :  { %v405_v40 = vsub.f32 1.5, %v404_v39 }
 0x37f   :  { %v485_v41 = vpop.eup %484 }
 0x380   :  { %v406_v42 = vmul.f32 %v483_v35, %v405_v40  ;;  %v412_v44 = vmul.f32 %v485_v41, %v400_v37  ;;  %vm418_vm13 = vweird.f32 %v485_v41 }
 0x381   :  { %vm419_vm15 = vmor %vm417_vm14, %vm418_vm13 }
 0x382   :  { %v410_v46 = vsel %vm409_vm12, %v483_v35, %v406_v42  ;;  %v413_v48 = vmul.f32 %v485_v41, %v412_v44 }
 0x383   :  { %v423_v47 = vmul.f32 %v421_v43, %v410_v46 }
 0x384   :  { %v414_v50 = vmul.f32 0.5, %v413_v48 }
 0x385   :  { %v428_v51 = vmul.f32 %v472_v45, %v423_v47 }
 0x386   :  { %v415_v52 = vsub.f32 1.5, %v414_v50 }
 0x387   :  { %v433_v53 = vadd.f32 %v473_v49, %v428_v51 }
 0x388   :  { %v416_v54 = vmul.f32 %v485_v41, %v415_v52 }
 0x389   :  { %435 = vst [vmem:[#allocation11] sm:$0xff] %v433_v53 }
 0x38a   :  { %v420_v56 = vsel %vm419_vm15, %v485_v41, %v416_v54 }
 0x38b   :  { %v424_v57 = vmul.f32 %v422_v55, %v420_v56 }
 0x38d   :  { %v429_v58 = vmul.f32 %v472_v45, %v424_v57 }
 0x38f   :  { %v434_v59 = vadd.f32 %v473_v49, %v429_v58 }
 0x391   :  { %436 = vst [vmem:[#allocation11 + $0x8] sm:$0xff] %v434_v59 }
 0x392   :  { %449 = dma.vmem_to_hbm [thread:$0]  %s442_s23, 256, %s444_s26, [#allocation4], %s639_s16, %s639_s16, %s640_s17  }
 0x393   :  { %636 = dma.done.wait [#allocation4], 256  }
 0x394   :  { %637 = vsyncadd [#allocation4], 4294967040 }
 0x395   :  { %454 = vsyncpa [#allocation3], 1 }
 0x396   :  { %455 = vsyncpa [#allocation6], 1 }
 0x397   :  { %456 = vsyncpa [#allocation9], 1 }
 0x398   :  { %457 = vsyncpa [#allocation4], 1 }

</bundles_post_ra>
